<compile_context>
chip_gen: v5e
topology: v5e:2x2
jax: 0.10.0
libtpu: 0.0.40
codegen_flags: <defaults>
</compile_context>

<pallas_src>
import functools
import math

import numpy as np
import jax
import jax.numpy as jnp
from jax import lax
from jax.experimental import pallas as pl
from jax.experimental.pallas import tpu as pltpu

_LANE = 128
_EXACT_N_MAX = 64        # exact O(N^2) lane-dense path for N <= this; bisection above
_MAX_LANE_TILE = 16384   # cap on rows per block (exact path)
_MAX_ROW_TILE = 512      # cap on rows per block (bisection path)
_BISECT_ITERS = 30


def _round_up(v, m):
    return ((v + m - 1) // m) * m


def _round_down(v, m):
    return (v // m) * m


def _vmem_limit_bytes():
    cap = 0
    try:
        cap = int(getattr(pltpu.get_tpu_info(), "vmem_capacity_bytes", 0) or 0)
    except Exception:
        cap = 0
    if cap <= 0:
        cap = 64 * 1024 * 1024
    # Clamp to 64 MiB: per-TensorCore safe on v7x even if the query reports a
    # per-chip capacity; far more than these kernels need on v5e/v6e anyway.
    return int(min(cap, 64 * 1024 * 1024))


def _sparsemax_kernel_exact(x_ref, o_ref, *, chunk):
    """Exact small-N kernel on a natural-layout (TL, Np) block.

    Each `chunk`-row slab is transposed in VMEM to (Np, chunk): the sparsemax
    axis lands on sublanes and `chunk` independent rows pack densely into
    lanes.  The rank/prefix sums are built with a fused running-add loop whose
    r/s accumulators stay vreg-resident across the whole unrolled Np loop.
    """
    tl, n = x_ref.shape
    n_chunks = tl // chunk

    def body(c, carry):
        c0 = pl.multiple_of(c * chunk, chunk)
        xt = x_ref[pl.ds(c0, chunk), :].astype(jnp.float32)    # (chunk, Np)
        z = jnp.transpose(xt)                                  # (Np, chunk) lane-dense
        z = z - jnp.max(z, axis=0, keepdims=True)
        r = jnp.zeros_like(z)      # r_j = #{i : z_i >= z_j}
        s = jnp.zeros_like(z)      # s_j = sum of z_i with z_i >= z_j
        for i in range(n):         # fully unrolled (Np <= 64)
            zi = z[i:i + 1, :]                                 # (1, chunk) static slice
            gef = (zi >= z).astype(jnp.float32)                # fused mask
            r = r + gef
            s = s + gef * zi
        # Tie-consistent support condition (== sorted 1 + k*zs_k > cumsum_k).
        supf = ((1.0 + r * z) > s).astype(jnp.float32)
        k = jnp.sum(supf, axis=0, keepdims=True)               # support size (>= 1)
        zs_sum = jnp.sum(supf * z, axis=0, keepdims=True)
        tau = (zs_sum - 1.0) / k                               # exact divide
        out = jnp.maximum(z - tau, 0.0)                        # (Np, chunk)
        o_ref[pl.ds(c0, chunk), :] = jnp.transpose(out).astype(o_ref.dtype)
        return carry

    lax.fori_loop(0, n_chunks, body, 0)


def _sparsemax_kernel_bisect(x_ref, o_ref, *, n_iters):
    """Large-N kernel on a natural-layout (TR, N) block.

    Bisection on tau (root of sum(relu(z - tau)) = 1; tau in [-1, 0] after the
    max shift) followed by ONE exact finishing step: the converged tau is used
    only to build the support mask, then tau is recomputed exactly as
    (sum_support(z) - 1) / k so the output matches the sort/cumsum reference.
    """
    x = x_ref[...].astype(jnp.float32)                         # (TR, N)
    z = x - jnp.max(x, axis=-1, keepdims=True)
    tr = z.shape[0]
    lo0 = jnp.full((tr, 1), -1.0, dtype=jnp.float32)
    hi0 = jnp.zeros((tr, 1), dtype=jnp.float32)

    def body(_, carry):
        lo, hi = carry
        mid = 0.5 * (lo + hi)
        f = jnp.sum(jnp.maximum(z - mid, 0.0), axis=-1, keepdims=True)
        too_low = f >= 1.0                                     # true tau >= mid
        lo = jnp.where(too_low, mid, lo)
        hi = jnp.where(too_low, hi, mid)
        return lo, hi

    lo, hi = lax.fori_loop(0, n_iters, body, (lo0, hi0))
    tau0 = 0.5 * (lo + hi)
    supf = (z > tau0).astype(jnp.float32)
    k = jnp.sum(supf, axis=-1, keepdims=True)                  # >= 1 (max elem always in)
    zs_sum = jnp.sum(supf * z, axis=-1, keepdims=True)
    tau = (zs_sum - 1.0) / k                                   # exact finishing step
    o_ref[...] = jnp.maximum(z - tau, 0.0).astype(o_ref.dtype)


def sparsemax(x, dim=-1):
    """Sparsemax along `dim`, matching the PyTorch module's forward pass."""
    x = jnp.asarray(x)
    nd = x.ndim
    if nd == 0:
        return jnp.ones_like(x)
    dim = dim % nd
    n = int(x.shape[dim])

    # Present data as (rows, n) with the sparsemax axis trailing.  When `dim`
    # is already trailing this is a free reshape (no HBM transpose).
    # TODO(synk): fold the non-trailing-dim permutation into the BlockSpec
    # index_map so that case also avoids the HBM transpose pass.
    trailing = (dim == nd - 1)
    xm = x if trailing else jnp.moveaxis(x, dim, -1)
    lead_shape = xm.shape[:-1]
    rows = int(math.prod(lead_shape)) if lead_shape else 1
    x2 = xm.reshape(rows, n)
    itemsize = jnp.dtype(x.dtype).itemsize

    vmem_limit = _vmem_limit_bytes()
    budget = vmem_limit // 3           # headroom for double-buffered I/O + f32 temps
    cparams = pltpu.CompilerParams(dimension_semantics=("parallel",),
                                   vmem_limit_bytes=vmem_limit)

    if n <= _EXACT_N_MAX:
        # ------------------- exact lane-dense path (small N) -------------------
        n_pad = max(8, _round_up(n, 8))
        if n_pad != n:
            # Padding value excluded from every real element's rank/sum and from
            # the support; must be finite in the input dtype (no 0*inf NaNs).
            pad_val = -1e30
            if jnp.issubdtype(x.dtype, jnp.floating) and jnp.finfo(x.dtype).max < 1e30:
                pad_val = float(jnp.finfo(x.dtype).min) / 2
            x2 = jnp.pad(x2, ((0, 0), (0, n_pad - n)), constant_values=pad_val)

        # Lane chunk sized so z/r/s (each (n_pad, chunk) f32) stay vreg-resident.
        chunk = min(512, max(_LANE, _round_down(8192 // n_pad, _LANE)))
        chunk = min(chunk, max(_LANE, _round_up(rows, _LANE)))
        rows_c = _round_up(rows, chunk)
        n_ch = rows_c // chunk

        # Block = as many chunks as fit under the caps, but keep >= 4 (even)
        # grid steps when rows allow: double-buffering + megacore sharding.
        tile_cap = min(_MAX_LANE_TILE,
                       max(chunk, _round_down(budget // (4 * n_pad * max(itemsize, 4)),
                                              chunk)))
        cap_chunks = max(1, tile_cap // chunk)
        steps = max(pl.cdiv(n_ch, cap_chunks), min(4, n_ch))
        if steps > 1 and steps % 2:
            steps += 1
        steps = min(steps, n_ch)
        cps = pl.cdiv(n_ch, steps)
        tl = cps * chunk
        rows_p = _round_up(rows, tl)
        if rows_p != rows:
            x2 = jnp.pad(x2, ((0, rows_p - rows), (0, 0)))
        grid = rows_p // tl

        cost = pl.CostEstimate(flops=int(6 * rows_p * n_pad * n_pad),
                               transcendentals=0,
                               bytes_accessed=int(2 * rows_p * n_pad * itemsize))
        out2 = pl.pallas_call(
            functools.partial(_sparsemax_kernel_exact, chunk=chunk),
            out_shape=jax.ShapeDtypeStruct((rows_p, n_pad), x.dtype),
            grid_spec=pltpu.PrefetchScalarGridSpec(
                num_scalar_prefetch=0,
                grid=(grid,),
                in_specs=[pl.BlockSpec((tl, n_pad), lambda i: (i, 0))],
                out_specs=pl.BlockSpec((tl, n_pad), lambda i: (i, 0)),
            ),
            compiler_params=cparams,
            cost_estimate=cost,
        )(x2)
        out2 = out2[:rows, :n]
    else:
        # ------------------- bisection path (large N) -------------------
        per_row = 4 * n * max(itemsize, 4) + 16 * n     # dbl-buffered I/O + f32 temps
        tr = _round_down(max(8, budget // per_row), 8)
        tr = max(8, min(tr, _MAX_ROW_TILE))
        rows_c = _round_up(rows, 8)
        tr = min(tr, rows_c)
        if rows_c >= 4 * 8 and rows_c // tr < 4:
            tr = max(8, _round_down(rows_c // 4, 8))     # >= 4 grid steps when possible
        rows_p = _round_up(rows, tr)
        if rows_p != rows:
            x2 = jnp.pad(x2, ((0, rows_p - rows), (0, 0)))
        grid = rows_p // tr

        cost = pl.CostEstimate(flops=int((4 * _BISECT_ITERS + 8) * rows_p * n),
                               transcendentals=0,
                               bytes_accessed=int(2 * rows_p * n * itemsize))
        out2 = pl.pallas_call(
            functools.partial(_sparsemax_kernel_bisect, n_iters=_BISECT_ITERS),
            out_shape=jax.ShapeDtypeStruct((rows_p, n), x.dtype),
            grid_spec=pltpu.PrefetchScalarGridSpec(
                num_scalar_prefetch=0,
                grid=(grid,),
                in_specs=[pl.BlockSpec((tr, n), lambda i: (i, 0))],
                out_specs=pl.BlockSpec((tr, n), lambda i: (i, 0)),
            ),
            compiler_params=cparams,
            cost_estimate=cost,
        )(x2)
        out2 = out2[:rows]

    out = out2.reshape(lead_shape + (n,))
    return out if trailing else jnp.moveaxis(out, -1, dim)


def _sparsemax_ref(x, dim=-1):
    """Pure-JAX reference mirroring the PyTorch sort/cumsum implementation."""
    xm = jnp.moveaxis(x, dim, -1)
    z = xm - jnp.max(xm, axis=-1, keepdims=True)
    zs = jnp.flip(jnp.sort(z, axis=-1), axis=-1)          # descending
    n = z.shape[-1]
    rng = jnp.arange(1, n + 1, dtype=z.dtype)
    cs = jnp.cumsum(zs, axis=-1)
    is_gt = (1.0 + rng * zs > cs).astype(z.dtype)
    k = jnp.max(is_gt * rng, axis=-1, keepdims=True)
    tau = (jnp.sum(is_gt * zs, axis=-1, keepdims=True) - 1.0) / k
    return jnp.moveaxis(jnp.maximum(z - tau, 0.0), -1, dim)


if __name__ == "__main__":
    key = jax.random.PRNGKey(0)
    k1, k2, k3 = jax.random.split(key, 3)

    # Main test: NCHW-like input, sparsemax over the last dim (exact lane-dense
    # path, N=16, natural layout — no wrapper transposes at all).
    x = jax.random.normal(k1, (2, 4, 16, 16), dtype=jnp.float32)
    y = jax.block_until_ready(sparsemax(x, dim=-1))
    y_ref = jax.block_until_ready(_sparsemax_ref(x, dim=-1))
    np.testing.assert_allclose(np.asarray(y), np.asarray(y_ref), atol=1e-5, rtol=1e-5)
    np.testing.assert_allclose(np.asarray(jnp.sum(y, axis=-1)), 1.0, atol=1e-5, rtol=1e-5)

    # Non-trailing dim (N=4, padded to 8 on the sparsemax axis inside the wrapper).
    y1 = jax.block_until_ready(sparsemax(x, dim=1))
    np.testing.assert_allclose(np.asarray(y1), np.asarray(_sparsemax_ref(x, dim=1)),
                               atol=1e-5, rtol=1e-5)

    # Ties: exact duplicate values (checks the rank-based support condition).
    base_vals = jax.random.normal(k2, (8, 8), dtype=jnp.float32)
    x_ties = jnp.concatenate([base_vals, base_vals], axis=-1)     # every value duplicated
    y_t = jax.block_until_ready(sparsemax(x_ties, dim=-1))
    np.testing.assert_allclose(np.asarray(y_t), np.asarray(_sparsemax_ref(x_ties, dim=-1)),
                               atol=1e-5, rtol=1e-5)

    # Larger feature dim -> bisection path (N > 64).
    x_big = jax.random.normal(k3, (4, 192), dtype=jnp.float32)
    y_b = jax.block_until_ready(sparsemax(x_big, dim=-1))
    np.testing.assert_allclose(np.asarray(y_b), np.asarray(_sparsemax_ref(x_big, dim=-1)),
                               atol=1e-5, rtol=1e-5)
    np.testing.assert_allclose(np.asarray(jnp.sum(y_b, axis=-1)), 1.0, atol=1e-5, rtol=1e-5)

    print("KERNEL_OK")
</pallas_src>

<mosaic_0001>
module attributes {stable_mosaic.version = 11 : i64} {
  func.func @_sparsemax_kernel_exact(%arg0: i32, %arg1: memref<128x16xf32, #tpu.memory_space<vmem>>, %arg2: memref<128x16xf32, #tpu.memory_space<vmem>>) attributes {dimension_semantics = [#tpu.dimension_semantics<parallel>], iteration_bounds = array<i64: 1>, scalar_prefetch = 0 : i64, scratch_operands = 0 : i64, tpu.core_type = #tpu.core_type<tc>, window_params = [{transform_indices = @transform_0, window_bounds = array<i64: 128, 16>}, {transform_indices = @transform_1, window_bounds = array<i64: 128, 16>}]} {
    %c0_i32 = arith.constant 0 : i32
    %c128_i32 = arith.constant 128 : i32
    %0 = arith.muli %c0_i32, %c128_i32 : i32
    %1 = tpu.assume_multiple %0, 128 : i32
    %2 = arith.index_cast %1 : i32 to index
    %c0 = arith.constant 0 : index
    %3 = vector.load %arg1[%2, %c0] : memref<128x16xf32, #tpu.memory_space<vmem>>, vector<128x16xf32>
    %4 = tpu.transpose %3, [1, 0] : vector<128x16xf32> -> vector<16x128xf32>
    %cst = arith.constant dense<0xFF800000> : vector<128xf32>
    %5 = vector.multi_reduction <maximumf>, %4, %cst [0] : vector<16x128xf32> to vector<128xf32>
    %6 = vector.shape_cast %5 : vector<128xf32> to vector<1x128xf32>
    %7 = vector.broadcast %6 : vector<1x128xf32> to vector<16x128xf32>
    %8 = arith.subf %4, %7 : vector<16x128xf32>
    %cst_0 = arith.constant 0.000000e+00 : f32
    %9 = vector.broadcast %cst_0 : f32 to vector<16x128xf32>
    %cst_1 = arith.constant 0.000000e+00 : f32
    %10 = vector.broadcast %cst_1 : f32 to vector<16x128xf32>
    %11 = vector.extract_strided_slice %8 {offsets = [0, 0], sizes = [1, 128], strides = [1, 1]} : vector<16x128xf32> to vector<1x128xf32>
    %12 = vector.broadcast %11 : vector<1x128xf32> to vector<16x128xf32>
    %13 = arith.cmpf oge, %12, %8 : vector<16x128xf32>
    %14 = arith.extui %13 : vector<16x128xi1> to vector<16x128xi32>
    %15 = arith.sitofp %14 : vector<16x128xi32> to vector<16x128xf32>
    %16 = arith.addf %9, %15 : vector<16x128xf32>
    %17 = vector.broadcast %11 : vector<1x128xf32> to vector<16x128xf32>
    %18 = arith.mulf %15, %17 : vector<16x128xf32>
    %19 = arith.addf %10, %18 : vector<16x128xf32>
    %20 = vector.extract_strided_slice %8 {offsets = [1, 0], sizes = [1, 128], strides = [1, 1]} : vector<16x128xf32> to vector<1x128xf32>
    %21 = vector.broadcast %20 : vector<1x128xf32> to vector<16x128xf32>
    %22 = arith.cmpf oge, %21, %8 : vector<16x128xf32>
    %23 = arith.extui %22 : vector<16x128xi1> to vector<16x128xi32>
    %24 = arith.sitofp %23 : vector<16x128xi32> to vector<16x128xf32>
    %25 = arith.addf %16, %24 : vector<16x128xf32>
    %26 = vector.broadcast %20 : vector<1x128xf32> to vector<16x128xf32>
    %27 = arith.mulf %24, %26 : vector<16x128xf32>
    %28 = arith.addf %19, %27 : vector<16x128xf32>
    %29 = vector.extract_strided_slice %8 {offsets = [2, 0], sizes = [1, 128], strides = [1, 1]} : vector<16x128xf32> to vector<1x128xf32>
    %30 = vector.broadcast %29 : vector<1x128xf32> to vector<16x128xf32>
    %31 = arith.cmpf oge, %30, %8 : vector<16x128xf32>
    %32 = arith.extui %31 : vector<16x128xi1> to vector<16x128xi32>
    %33 = arith.sitofp %32 : vector<16x128xi32> to vector<16x128xf32>
    %34 = arith.addf %25, %33 : vector<16x128xf32>
    %35 = vector.broadcast %29 : vector<1x128xf32> to vector<16x128xf32>
    %36 = arith.mulf %33, %35 : vector<16x128xf32>
    %37 = arith.addf %28, %36 : vector<16x128xf32>
    %38 = vector.extract_strided_slice %8 {offsets = [3, 0], sizes = [1, 128], strides = [1, 1]} : vector<16x128xf32> to vector<1x128xf32>
    %39 = vector.broadcast %38 : vector<1x128xf32> to vector<16x128xf32>
    %40 = arith.cmpf oge, %39, %8 : vector<16x128xf32>
    %41 = arith.extui %40 : vector<16x128xi1> to vector<16x128xi32>
    %42 = arith.sitofp %41 : vector<16x128xi32> to vector<16x128xf32>
    %43 = arith.addf %34, %42 : vector<16x128xf32>
    %44 = vector.broadcast %38 : vector<1x128xf32> to vector<16x128xf32>
    %45 = arith.mulf %42, %44 : vector<16x128xf32>
    %46 = arith.addf %37, %45 : vector<16x128xf32>
    %47 = vector.extract_strided_slice %8 {offsets = [4, 0], sizes = [1, 128], strides = [1, 1]} : vector<16x128xf32> to vector<1x128xf32>
    %48 = vector.broadcast %47 : vector<1x128xf32> to vector<16x128xf32>
    %49 = arith.cmpf oge, %48, %8 : vector<16x128xf32>
    %50 = arith.extui %49 : vector<16x128xi1> to vector<16x128xi32>
    %51 = arith.sitofp %50 : vector<16x128xi32> to vector<16x128xf32>
    %52 = arith.addf %43, %51 : vector<16x128xf32>
    %53 = vector.broadcast %47 : vector<1x128xf32> to vector<16x128xf32>
    %54 = arith.mulf %51, %53 : vector<16x128xf32>
    %55 = arith.addf %46, %54 : vector<16x128xf32>
    %56 = vector.extract_strided_slice %8 {offsets = [5, 0], sizes = [1, 128], strides = [1, 1]} : vector<16x128xf32> to vector<1x128xf32>
    %57 = vector.broadcast %56 : vector<1x128xf32> to vector<16x128xf32>
    %58 = arith.cmpf oge, %57, %8 : vector<16x128xf32>
    %59 = arith.extui %58 : vector<16x128xi1> to vector<16x128xi32>
    %60 = arith.sitofp %59 : vector<16x128xi32> to vector<16x128xf32>
    %61 = arith.addf %52, %60 : vector<16x128xf32>
    %62 = vector.broadcast %56 : vector<1x128xf32> to vector<16x128xf32>
    %63 = arith.mulf %60, %62 : vector<16x128xf32>
    %64 = arith.addf %55, %63 : vector<16x128xf32>
    %65 = vector.extract_strided_slice %8 {offsets = [6, 0], sizes = [1, 128], strides = [1, 1]} : vector<16x128xf32> to vector<1x128xf32>
    %66 = vector.broadcast %65 : vector<1x128xf32> to vector<16x128xf32>
    %67 = arith.cmpf oge, %66, %8 : vector<16x128xf32>
    %68 = arith.extui %67 : vector<16x128xi1> to vector<16x128xi32>
    %69 = arith.sitofp %68 : vector<16x128xi32> to vector<16x128xf32>
    %70 = arith.addf %61, %69 : vector<16x128xf32>
    %71 = vector.broadcast %65 : vector<1x128xf32> to vector<16x128xf32>
    %72 = arith.mulf %69, %71 : vector<16x128xf32>
    %73 = arith.addf %64, %72 : vector<16x128xf32>
    %74 = vector.extract_strided_slice %8 {offsets = [7, 0], sizes = [1, 128], strides = [1, 1]} : vector<16x128xf32> to vector<1x128xf32>
    %75 = vector.broadcast %74 : vector<1x128xf32> to vector<16x128xf32>
    %76 = arith.cmpf oge, %75, %8 : vector<16x128xf32>
    %77 = arith.extui %76 : vector<16x128xi1> to vector<16x128xi32>
    %78 = arith.sitofp %77 : vector<16x128xi32> to vector<16x128xf32>
    %79 = arith.addf %70, %78 : vector<16x128xf32>
    %80 = vector.broadcast %74 : vector<1x128xf32> to vector<16x128xf32>
    %81 = arith.mulf %78, %80 : vector<16x128xf32>
    %82 = arith.addf %73, %81 : vector<16x128xf32>
    %83 = vector.extract_strided_slice %8 {offsets = [8, 0], sizes = [1, 128], strides = [1, 1]} : vector<16x128xf32> to vector<1x128xf32>
    %84 = vector.broadcast %83 : vector<1x128xf32> to vector<16x128xf32>
    %85 = arith.cmpf oge, %84, %8 : vector<16x128xf32>
    %86 = arith.extui %85 : vector<16x128xi1> to vector<16x128xi32>
    %87 = arith.sitofp %86 : vector<16x128xi32> to vector<16x128xf32>
    %88 = arith.addf %79, %87 : vector<16x128xf32>
    %89 = vector.broadcast %83 : vector<1x128xf32> to vector<16x128xf32>
    %90 = arith.mulf %87, %89 : vector<16x128xf32>
    %91 = arith.addf %82, %90 : vector<16x128xf32>
    %92 = vector.extract_strided_slice %8 {offsets = [9, 0], sizes = [1, 128], strides = [1, 1]} : vector<16x128xf32> to vector<1x128xf32>
    %93 = vector.broadcast %92 : vector<1x128xf32> to vector<16x128xf32>
    %94 = arith.cmpf oge, %93, %8 : vector<16x128xf32>
    %95 = arith.extui %94 : vector<16x128xi1> to vector<16x128xi32>
    %96 = arith.sitofp %95 : vector<16x128xi32> to vector<16x128xf32>
    %97 = arith.addf %88, %96 : vector<16x128xf32>
    %98 = vector.broadcast %92 : vector<1x128xf32> to vector<16x128xf32>
    %99 = arith.mulf %96, %98 : vector<16x128xf32>
    %100 = arith.addf %91, %99 : vector<16x128xf32>
    %101 = vector.extract_strided_slice %8 {offsets = [10, 0], sizes = [1, 128], strides = [1, 1]} : vector<16x128xf32> to vector<1x128xf32>
    %102 = vector.broadcast %101 : vector<1x128xf32> to vector<16x128xf32>
    %103 = arith.cmpf oge, %102, %8 : vector<16x128xf32>
    %104 = arith.extui %103 : vector<16x128xi1> to vector<16x128xi32>
    %105 = arith.sitofp %104 : vector<16x128xi32> to vector<16x128xf32>
    %106 = arith.addf %97, %105 : vector<16x128xf32>
    %107 = vector.broadcast %101 : vector<1x128xf32> to vector<16x128xf32>
    %108 = arith.mulf %105, %107 : vector<16x128xf32>
    %109 = arith.addf %100, %108 : vector<16x128xf32>
    %110 = vector.extract_strided_slice %8 {offsets = [11, 0], sizes = [1, 128], strides = [1, 1]} : vector<16x128xf32> to vector<1x128xf32>
    %111 = vector.broadcast %110 : vector<1x128xf32> to vector<16x128xf32>
    %112 = arith.cmpf oge, %111, %8 : vector<16x128xf32>
    %113 = arith.extui %112 : vector<16x128xi1> to vector<16x128xi32>
    %114 = arith.sitofp %113 : vector<16x128xi32> to vector<16x128xf32>
    %115 = arith.addf %106, %114 : vector<16x128xf32>
    %116 = vector.broadcast %110 : vector<1x128xf32> to vector<16x128xf32>
    %117 = arith.mulf %114, %116 : vector<16x128xf32>
    %118 = arith.addf %109, %117 : vector<16x128xf32>
    %119 = vector.extract_strided_slice %8 {offsets = [12, 0], sizes = [1, 128], strides = [1, 1]} : vector<16x128xf32> to vector<1x128xf32>
    %120 = vector.broadcast %119 : vector<1x128xf32> to vector<16x128xf32>
    %121 = arith.cmpf oge, %120, %8 : vector<16x128xf32>
    %122 = arith.extui %121 : vector<16x128xi1> to vector<16x128xi32>
    %123 = arith.sitofp %122 : vector<16x128xi32> to vector<16x128xf32>
    %124 = arith.addf %115, %123 : vector<16x128xf32>
    %125 = vector.broadcast %119 : vector<1x128xf32> to vector<16x128xf32>
    %126 = arith.mulf %123, %125 : vector<16x128xf32>
    %127 = arith.addf %118, %126 : vector<16x128xf32>
    %128 = vector.extract_strided_slice %8 {offsets = [13, 0], sizes = [1, 128], strides = [1, 1]} : vector<16x128xf32> to vector<1x128xf32>
    %129 = vector.broadcast %128 : vector<1x128xf32> to vector<16x128xf32>
    %130 = arith.cmpf oge, %129, %8 : vector<16x128xf32>
    %131 = arith.extui %130 : vector<16x128xi1> to vector<16x128xi32>
    %132 = arith.sitofp %131 : vector<16x128xi32> to vector<16x128xf32>
    %133 = arith.addf %124, %132 : vector<16x128xf32>
    %134 = vector.broadcast %128 : vector<1x128xf32> to vector<16x128xf32>
    %135 = arith.mulf %132, %134 : vector<16x128xf32>
    %136 = arith.addf %127, %135 : vector<16x128xf32>
    %137 = vector.extract_strided_slice %8 {offsets = [14, 0], sizes = [1, 128], strides = [1, 1]} : vector<16x128xf32> to vector<1x128xf32>
    %138 = vector.broadcast %137 : vector<1x128xf32> to vector<16x128xf32>
    %139 = arith.cmpf oge, %138, %8 : vector<16x128xf32>
    %140 = arith.extui %139 : vector<16x128xi1> to vector<16x128xi32>
    %141 = arith.sitofp %140 : vector<16x128xi32> to vector<16x128xf32>
    %142 = arith.addf %133, %141 : vector<16x128xf32>
    %143 = vector.broadcast %137 : vector<1x128xf32> to vector<16x128xf32>
    %144 = arith.mulf %141, %143 : vector<16x128xf32>
    %145 = arith.addf %136, %144 : vector<16x128xf32>
    %146 = vector.extract_strided_slice %8 {offsets = [15, 0], sizes = [1, 128], strides = [1, 1]} : vector<16x128xf32> to vector<1x128xf32>
    %147 = vector.broadcast %146 : vector<1x128xf32> to vector<16x128xf32>
    %148 = arith.cmpf oge, %147, %8 : vector<16x128xf32>
    %149 = arith.extui %148 : vector<16x128xi1> to vector<16x128xi32>
    %150 = arith.sitofp %149 : vector<16x128xi32> to vector<16x128xf32>
    %151 = arith.addf %142, %150 : vector<16x128xf32>
    %152 = vector.broadcast %146 : vector<1x128xf32> to vector<16x128xf32>
    %153 = arith.mulf %150, %152 : vector<16x128xf32>
    %154 = arith.addf %145, %153 : vector<16x128xf32>
    %155 = arith.mulf %151, %8 : vector<16x128xf32>
    %cst_2 = arith.constant 1.000000e+00 : f32
    %156 = vector.broadcast %cst_2 : f32 to vector<16x128xf32>
    %157 = arith.addf %156, %155 : vector<16x128xf32>
    %158 = arith.cmpf ogt, %157, %154 : vector<16x128xf32>
    %159 = arith.extui %158 : vector<16x128xi1> to vector<16x128xi32>
    %160 = arith.sitofp %159 : vector<16x128xi32> to vector<16x128xf32>
    %cst_3 = arith.constant dense<0.000000e+00> : vector<128xf32>
    %161 = vector.multi_reduction <add>, %160, %cst_3 [0] : vector<16x128xf32> to vector<128xf32>
    %162 = vector.shape_cast %161 : vector<128xf32> to vector<1x128xf32>
    %163 = arith.mulf %160, %8 : vector<16x128xf32>
    %cst_4 = arith.constant dense<0.000000e+00> : vector<128xf32>
    %164 = vector.multi_reduction <add>, %163, %cst_4 [0] : vector<16x128xf32> to vector<128xf32>
    %165 = vector.shape_cast %164 : vector<128xf32> to vector<1x128xf32>
    %cst_5 = arith.constant 1.000000e+00 : f32
    %166 = vector.broadcast %cst_5 : f32 to vector<1x128xf32>
    %167 = arith.subf %165, %166 : vector<1x128xf32>
    %168 = arith.divf %167, %162 : vector<1x128xf32>
    %169 = vector.broadcast %168 : vector<1x128xf32> to vector<16x128xf32>
    %170 = arith.subf %8, %169 : vector<16x128xf32>
    %cst_6 = arith.constant 0.000000e+00 : f32
    %171 = vector.broadcast %cst_6 : f32 to vector<16x128xf32>
    %172 = arith.maximumf %170, %171 : vector<16x128xf32>
    %173 = tpu.transpose %172, [1, 0] : vector<16x128xf32> -> vector<128x16xf32>
    %174 = arith.index_cast %1 : i32 to index
    %c0_7 = arith.constant 0 : index
    %175 = vector.load %arg2[%174, %c0_7] : memref<128x16xf32, #tpu.memory_space<vmem>>, vector<128x16xf32>
    tpu.vector_store %arg2[%174, %c0_7], %173 {strides = array<i32>} : memref<128x16xf32, #tpu.memory_space<vmem>>, vector<128x16xf32>,
    %c1_i32 = arith.constant 1 : i32
    return
  }
  func.func @transform_0(%arg0: i32) -> (i32, i32) {
    %c0_i32 = arith.constant 0 : i32
    %c0_i32_0 = arith.constant 0 : i32
    return %arg0, %c0_i32 : i32, i32
  }
  func.func @transform_1(%arg0: i32) -> (i32, i32) {
    %c0_i32 = arith.constant 0 : i32
    %c0_i32_0 = arith.constant 0 : i32
    return %arg0, %c0_i32 : i32, i32
  }
}

</mosaic_0001>

<bundles_post_ra>
// kernel: tpu_custom_call.1
= control target key start
LH: loop header
LB: loop body
LE: loop exit
PB: predicated region body
PF: predicated region fallthrough
CT: control target
= control target key end

     0   :  { %v410_v35 = vmov 0.0   ;;  %s637_s0 = inlined_call_operand.vmem [shape: f32[128,16], index: 0, kind: input, shape index: {}]   ;;  %s638_s1 = inlined_call_operand.vmem [shape: f32[128,16], index: 1, kind: output, shape index: {}]  }
   0x1   :  { %v8_v0 = vld [vmem:[%s637_s0] sm:$0xff]  ;;  %v9_v1 = vld [vmem:[%s637_s0 + $0x8] sm:$0xff]  ;;  %v10_v2 = vld [vmem:[%s637_s0 + $0x10] sm:$0xff] }
   0x2   :  { %24 = vxpose.xlu0.b32.start [1/16] (narrow) %v8_v0, 16  ;;  %v11_v3 = vld [vmem:[%s637_s0 + $0x18] sm:$0xff]  ;;  %v12_v4 = vld [vmem:[%s637_s0 + $0x20] sm:$0xff]  ;;  %v13_v5 = vld [vmem:[%s637_s0 + $0x28] sm:$0xff] }
   0x3   :  { %v14_v6 = vld [vmem:[%s637_s0 + $0x30] sm:$0xff]  ;;  %v15_v7 = vld [vmem:[%s637_s0 + $0x38] sm:$0xff]  ;;  %v16_v8 = vld [vmem:[%s637_s0 + $0x40] sm:$0xff] }
   0x4   :  { %v17_v9 = vld [vmem:[%s637_s0 + $0x48] sm:$0xff]  ;;  %v18_v10 = vld [vmem:[%s637_s0 + $0x50] sm:$0xff]  ;;  %v19_v11 = vld [vmem:[%s637_s0 + $0x58] sm:$0xff] }
   0x5   :  { %v20_v12 = vld [vmem:[%s637_s0 + $0x60] sm:$0xff]  ;;  %v21_v13 = vld [vmem:[%s637_s0 + $0x68] sm:$0xff]  ;;  %v22_v14 = vld [vmem:[%s637_s0 + $0x70] sm:$0xff] }
   0x6   :  { %v23_v15 = vld [vmem:[%s637_s0 + $0x78] sm:$0xff] }
   0xa   :  { %25 = vxpose.xlu0.b32.cont [2/16] (narrow) %v9_v1, 16 }
  0x12   :  { %26 = vxpose.xlu0.b32.cont [3/16] (narrow) %v10_v2, 16 }
  0x1a   :  { %27 = vxpose.xlu0.b32.cont [4/16] (narrow) %v11_v3, 16 }
  0x22   :  { %28 = vxpose.xlu0.b32.cont [5/16] (narrow) %v12_v4, 16 }
  0x2a   :  { %29 = vxpose.xlu0.b32.cont [6/16] (narrow) %v13_v5, 16 }
  0x32   :  { %30 = vxpose.xlu0.b32.cont [7/16] (narrow) %v14_v6, 16 }
  0x3a   :  { %31 = vxpose.xlu0.b32.cont [8/16] (narrow) %v15_v7, 16 }
  0x42   :  { %32 = vxpose.xlu0.b32.cont [9/16] (narrow) %v16_v8, 16 }
  0x4a   :  { %33 = vxpose.xlu0.b32.cont [10/16] (narrow) %v17_v9, 16 }
  0x52   :  { %34 = vxpose.xlu0.b32.cont [11/16] (narrow) %v18_v10, 16 }
  0x5a   :  { %35 = vxpose.xlu0.b32.cont [12/16] (narrow) %v19_v11, 16 }
  0x62   :  { %36 = vxpose.xlu0.b32.cont [13/16] (narrow) %v20_v12, 16 }
  0x6a   :  { %37 = vxpose.xlu0.b32.cont [14/16] (narrow) %v21_v13, 16 }
  0x72   :  { %38 = vxpose.xlu0.b32.cont [15/16] (narrow) %v22_v14, 16 }
  0x7a   :  { %39 = vxpose.xlu0.b32.end [16/16] (narrow) %v23_v15, 16 }
  0xa6   :  { %v40_v16 = vpop.trf.xlu0 }
  0xae   :  { %v41_v17 = vpop.trf.xlu0 }
  0xaf   :  { %v56_v18 = vmax.f32 %v40_v16, %v41_v17 }
  0xb1   :  { %v57_v19 = vrot.slane %v56_v18, 4 }
  0xb3   :  { %v58_v20 = vmax.f32 %v56_v18, %v57_v19 }
  0xb5   :  { %v59_v21 = vrot.slane %v58_v20, 2 }
  0xb7   :  { %v60_v22 = vmax.f32 %v58_v20, %v59_v21 }
  0xb9   :  { %v61_v23 = vrot.slane %v60_v22, 1 }
  0xbb   :  { %v62_v24 = vmax.f32 %v60_v22, %v61_v23 }
  0xbd   :  { %v469_v25 = vsub.f32 %v40_v16, %v62_v24  ;;  %v471_v26 = vsub.f32 %v41_v17, %v62_v24 }
  0xbf   :  { %v65_v27 = vperm.slane %v469_v25, 0  ;;  %v78_v28 = vperm.slane %v469_v25, 1  ;;  %v91_v29 = vperm.slane %v469_v25, 2  ;;  %v104_v30 = vperm.slane %v469_v25, 3 }
  0xc0   :  { %v117_v31 = vperm.slane %v469_v25, 4  ;;  %v130_v32 = vperm.slane %v469_v25, 5  ;;  %v480_v33 = vperm.slane %v469_v25, 6  ;;  %v483_v34 = vperm.slane %v469_v25, 7 }
  0xc1   :  { %vm66_vm0 = vcmp.ge.f32.partialorder %v65_v27, %v469_v25  ;;  %vm67_vm1 = vcmp.ge.f32.partialorder %v65_v27, %v471_v26  ;;  %vm79_vm2 = vcmp.ge.f32.partialorder %v78_v28, %v469_v25  ;;  %vm80_vm3 = vcmp.ge.f32.partialorder %v78_v28, %v471_v26 }
  0xc2   :  { %v372_v36 = vsel %vm66_vm0, 1.0, %v410_v35  ;;  %v373_v37 = vsel %vm67_vm1, 1.0, %v410_v35  ;;  %v374_v38 = vsel %vm79_vm2, 1.0, %v410_v35  ;;  %v375_v39 = vsel %vm80_vm3, 1.0, %v410_v35 }
  0xc3   :  { %v74_v40 = vmul.f32 %v372_v36, %v65_v27  ;;  %v75_v41 = vmul.f32 %v373_v37, %v65_v27  ;;  %v85_v42 = vadd.f32 %v374_v38, %v372_v36  ;;  %v86_v43 = vadd.f32 %v375_v39, %v373_v37 }
  0xc4   :  { %v87_v44 = vmul.f32 %v374_v38, %v78_v28  ;;  %v88_v45 = vmul.f32 %v375_v39, %v78_v28  ;;  %vm92_vm4 = vcmp.ge.f32.partialorder %v91_v29, %v469_v25  ;;  %vm93_vm5 = vcmp.ge.f32.partialorder %v91_v29, %v471_v26 }
  0xc5   :  { %v376_v46 = vsel %vm92_vm4, 1.0, %v410_v35  ;;  %v377_v47 = vsel %vm93_vm5, 1.0, %v410_v35  ;;  %vm105_vm6 = vcmp.ge.f32.partialorder %v104_v30, %v469_v25  ;;  %vm106_vm7 = vcmp.ge.f32.partialorder %v104_v30, %v471_v26 }
  0xc6   :  { %v89_v48 = vadd.f32 %v87_v44, %v74_v40  ;;  %v90_v49 = vadd.f32 %v88_v45, %v75_v41  ;;  %v98_v50 = vadd.f32 %v376_v46, %v85_v42  ;;  %v99_v51 = vadd.f32 %v377_v47, %v86_v43 }
  0xc7   :  { %v100_v52 = vmul.f32 %v376_v46, %v91_v29  ;;  %v101_v53 = vmul.f32 %v377_v47, %v91_v29  ;;  %v378_v54 = vsel %vm105_vm6, 1.0, %v410_v35  ;;  %v379_v55 = vsel %vm106_vm7, 1.0, %v410_v35 }
  0xc8   :  { %v111_v56 = vadd.f32 %v378_v54, %v98_v50  ;;  %v112_v57 = vadd.f32 %v379_v55, %v99_v51  ;;  %v113_v58 = vmul.f32 %v378_v54, %v104_v30  ;;  %v114_v59 = vmul.f32 %v379_v55, %v104_v30 }
  0xc9   :  { %v102_v60 = vadd.f32 %v100_v52, %v89_v48  ;;  %v103_v61 = vadd.f32 %v101_v53, %v90_v49  ;;  %vm118_vm8 = vcmp.ge.f32.partialorder %v117_v31, %v469_v25  ;;  %vm119_vm9 = vcmp.ge.f32.partialorder %v117_v31, %v471_v26 }
  0xca   :  { %v380_v62 = vsel %vm118_vm8, 1.0, %v410_v35  ;;  %v381_v63 = vsel %vm119_vm9, 1.0, %v410_v35  ;;  %vm131_vm10 = vcmp.ge.f32.partialorder %v130_v32, %v469_v25  ;;  %vm132_vm11 = vcmp.ge.f32.partialorder %v130_v32, %v471_v26 }
  0xcb   :  { %v115_v0 = vadd.f32 %v113_v58, %v102_v60  ;;  %v116_v1 = vadd.f32 %v114_v59, %v103_v61  ;;  %v124_v2 = vadd.f32 %v380_v62, %v111_v56  ;;  %v125_v3 = vadd.f32 %v381_v63, %v112_v57 }
  0xcc   :  { %v126_v4 = vmul.f32 %v380_v62, %v117_v31  ;;  %v127_v5 = vmul.f32 %v381_v63, %v117_v31  ;;  %v382_v6 = vsel %vm131_vm10, 1.0, %v410_v35  ;;  %v383_v7 = vsel %vm132_vm11, 1.0, %v410_v35 }
  0xcd   :  { %v137_v8 = vadd.f32 %v382_v6, %v124_v2  ;;  %v138_v9 = vadd.f32 %v383_v7, %v125_v3  ;;  %v139_v10 = vmul.f32 %v382_v6, %v130_v32  ;;  %v140_v11 = vmul.f32 %v383_v7, %v130_v32 }
  0xce   :  { %v128_v12 = vadd.f32 %v126_v4, %v115_v0  ;;  %v129_v13 = vadd.f32 %v127_v5, %v116_v1  ;;  %vm144_vm12 = vcmp.ge.f32.partialorder %v480_v33, %v469_v25  ;;  %vm145_vm13 = vcmp.ge.f32.partialorder %v480_v33, %v471_v26 }
  0xcf   :  { %v384_v14 = vsel %vm144_vm12, 1.0, %v410_v35  ;;  %v385_v15 = vsel %vm145_vm13, 1.0, %v410_v35  ;;  %vm157_vm14 = vcmp.ge.f32.partialorder %v483_v34, %v469_v25  ;;  %vm158_vm15 = vcmp.ge.f32.partialorder %v483_v34, %v471_v26 }
  0xd0   :  { %v141_v16 = vadd.f32 %v139_v10, %v128_v12  ;;  %v142_v17 = vadd.f32 %v140_v11, %v129_v13  ;;  %v150_v18 = vadd.f32 %v384_v14, %v137_v8  ;;  %v151_v19 = vadd.f32 %v385_v15, %v138_v9 }
  0xd1   :  { %v152_v20 = vmul.f32 %v384_v14, %v480_v33  ;;  %v153_v21 = vmul.f32 %v385_v15, %v480_v33  ;;  %v386_v22 = vsel %vm157_vm14, 1.0, %v410_v35  ;;  %v387_v23 = vsel %vm158_vm15, 1.0, %v410_v35 }
  0xd2   :  { %v163_v24 = vadd.f32 %v386_v22, %v150_v18  ;;  %v164_v27 = vadd.f32 %v387_v23, %v151_v19  ;;  %v165_v28 = vmul.f32 %v386_v22, %v483_v34  ;;  %v166_v29 = vmul.f32 %v387_v23, %v483_v34 }
  0xd3   :  { %v154_v30 = vadd.f32 %v152_v20, %v141_v16  ;;  %v155_v31 = vadd.f32 %v153_v21, %v142_v17  ;;  %v169_v32 = vperm.slane %v471_v26, 0  ;;  %v182_v36 = vperm.slane %v471_v26, 1 }
  0xd4   :  { %v195_v37 = vperm.slane %v471_v26, 2  ;;  %v208_v33 = vperm.slane %v471_v26, 3  ;;  %v221_v38 = vperm.slane %v471_v26, 4  ;;  %v234_v39 = vperm.slane %v471_v26, 5 }
  0xd5   :  { %v167_v40 = vadd.f32 %v165_v28, %v154_v30  ;;  %v168_v41 = vadd.f32 %v166_v29, %v155_v31  ;;  %vm170_vm0 = vcmp.ge.f32.partialorder %v169_v32, %v469_v25  ;;  %vm171_vm1 = vcmp.ge.f32.partialorder %v169_v32, %v471_v26 }
  0xd6   :  { %v388_v34 = vsel %vm170_vm0, 1.0, %v410_v35  ;;  %v389_v42 = vsel %vm171_vm1, 1.0, %v410_v35  ;;  %vm183_vm2 = vcmp.ge.f32.partialorder %v182_v36, %v469_v25  ;;  %vm184_vm3 = vcmp.ge.f32.partialorder %v182_v36, %v471_v26 }
  0xd7   :  { %v176_v43 = vadd.f32 %v388_v34, %v163_v24  ;;  %v177_v44 = vadd.f32 %v389_v42, %v164_v27  ;;  %v178_v45 = vmul.f32 %v388_v34, %v169_v32  ;;  %v179_v46 = vmul.f32 %v389_v42, %v169_v32 }
  0xd8   :  { %v390_v47 = vsel %vm183_vm2, 1.0, %v410_v35  ;;  %v391_v48 = vsel %vm184_vm3, 1.0, %v410_v35  ;;  %vm196_vm4 = vcmp.ge.f32.partialorder %v195_v37, %v469_v25  ;;  %vm197_vm5 = vcmp.ge.f32.partialorder %v195_v37, %v471_v26 }
  0xd9   :  { %v180_v49 = vadd.f32 %v178_v45, %v167_v40  ;;  %v181_v50 = vadd.f32 %v179_v46, %v168_v41  ;;  %v189_v51 = vadd.f32 %v390_v47, %v176_v43  ;;  %v190_v52 = vadd.f32 %v391_v48, %v177_v44 }
  0xda   :  { %v191_v53 = vmul.f32 %v390_v47, %v182_v36  ;;  %v192_v54 = vmul.f32 %v391_v48, %v182_v36  ;;  %v392_v55 = vsel %vm196_vm4, 1.0, %v410_v35  ;;  %v393_v56 = vsel %vm197_vm5, 1.0, %v410_v35 }
  0xdb   :  { %v202_v57 = vadd.f32 %v392_v55, %v189_v51  ;;  %v203_v58 = vadd.f32 %v393_v56, %v190_v52  ;;  %v204_v59 = vmul.f32 %v392_v55, %v195_v37  ;;  %v205_v60 = vmul.f32 %v393_v56, %v195_v37 }
  0xdc   :  { %v193_v61 = vadd.f32 %v191_v53, %v180_v49  ;;  %v194_v62 = vadd.f32 %v192_v54, %v181_v50  ;;  %vm209_vm6 = vcmp.ge.f32.partialorder %v208_v33, %v469_v25  ;;  %vm210_vm7 = vcmp.ge.f32.partialorder %v208_v33, %v471_v26 }
  0xdd   :  { %v394_v63 = vsel %vm209_vm6, 1.0, %v410_v35  ;;  %v395_v0 = vsel %vm210_vm7, 1.0, %v410_v35  ;;  %vm222_vm8 = vcmp.ge.f32.partialorder %v221_v38, %v469_v25  ;;  %vm223_vm9 = vcmp.ge.f32.partialorder %v221_v38, %v471_v26 }
  0xde   :  { %v206_v1 = vadd.f32 %v204_v59, %v193_v61  ;;  %v207_v2 = vadd.f32 %v205_v60, %v194_v62  ;;  %v215_v3 = vadd.f32 %v394_v63, %v202_v57  ;;  %v216_v4 = vadd.f32 %v395_v0, %v203_v58 }
  0xdf   :  { %v217_v5 = vmul.f32 %v394_v63, %v208_v33  ;;  %v218_v6 = vmul.f32 %v395_v0, %v208_v33  ;;  %v396_v7 = vsel %vm222_vm8, 1.0, %v410_v35  ;;  %v397_v8 = vsel %vm223_vm9, 1.0, %v410_v35 }
  0xe0   :  { %v228_v9 = vadd.f32 %v396_v7, %v215_v3  ;;  %v229_v10 = vadd.f32 %v397_v8, %v216_v4  ;;  %v230_v11 = vmul.f32 %v396_v7, %v221_v38  ;;  %v231_v12 = vmul.f32 %v397_v8, %v221_v38 }
  0xe1   :  { %v219_v13 = vadd.f32 %v217_v5, %v206_v1  ;;  %v220_v14 = vadd.f32 %v218_v6, %v207_v2  ;;  %vm235_vm10 = vcmp.ge.f32.partialorder %v234_v39, %v469_v25  ;;  %vm236_vm11 = vcmp.ge.f32.partialorder %v234_v39, %v471_v26 }
  0xe2   :  { %v398_v15 = vsel %vm235_vm10, 1.0, %v410_v35  ;;  %v399_v16 = vsel %vm236_vm11, 1.0, %v410_v35  ;;  %v247_v17 = vperm.slane %v471_v26, 6  ;;  %v260_v18 = vperm.slane %v471_v26, 7 }
  0xe3   :  { %v232_v19 = vadd.f32 %v230_v11, %v219_v13  ;;  %v233_v20 = vadd.f32 %v231_v12, %v220_v14  ;;  %v241_v21 = vadd.f32 %v398_v15, %v228_v9  ;;  %v242_v22 = vadd.f32 %v399_v16, %v229_v10 }
  0xe4   :  { %v243_v23 = vmul.f32 %v398_v15, %v234_v39  ;;  %v244_v24 = vmul.f32 %v399_v16, %v234_v39  ;;  %vm248_vm12 = vcmp.ge.f32.partialorder %v247_v17, %v469_v25  ;;  %vm249_vm13 = vcmp.ge.f32.partialorder %v247_v17, %v471_v26 }
  0xe5   :  { %v400_v27 = vsel %vm248_vm12, 1.0, %v410_v35  ;;  %v401_v28 = vsel %vm249_vm13, 1.0, %v410_v35  ;;  %vm261_vm14 = vcmp.ge.f32.partialorder %v260_v18, %v469_v25  ;;  %vm262_vm15 = vcmp.ge.f32.partialorder %v260_v18, %v471_v26 }
  0xe6   :  { %v245_v29 = vadd.f32 %v243_v23, %v232_v19  ;;  %v246_v30 = vadd.f32 %v244_v24, %v233_v20  ;;  %v254_v31 = vadd.f32 %v400_v27, %v241_v21  ;;  %v255_v32 = vadd.f32 %v401_v28, %v242_v22 }
  0xe7   :  { %v256_v36 = vmul.f32 %v400_v27, %v247_v17  ;;  %v257_v37 = vmul.f32 %v401_v28, %v247_v17  ;;  %v402_v33 = vsel %vm261_vm14, 1.0, %v410_v35  ;;  %v403_v38 = vsel %vm262_vm15, 1.0, %v410_v35 }
  0xe8   :  { %v267_v39 = vadd.f32 %v402_v33, %v254_v31  ;;  %v268_v40 = vadd.f32 %v403_v38, %v255_v32  ;;  %v269_v42 = vmul.f32 %v402_v33, %v260_v18  ;;  %v270_v43 = vmul.f32 %v403_v38, %v260_v18 }
  0xe9   :  { %v258_v41 = vadd.f32 %v256_v36, %v245_v29  ;;  %v259_v34 = vadd.f32 %v257_v37, %v246_v30  ;;  %vm351_vm6 = vcmask 130048  }
  0xea   :  { %v273_v44 = vmul.f32 %v267_v39, %v469_v25  ;;  %v274_v45 = vmul.f32 %v268_v40, %v471_v26 }
  0xeb   :  { %v271_v46 = vadd.f32 %v269_v42, %v258_v41  ;;  %v272_v47 = vadd.f32 %v270_v43, %v259_v34 }
  0xec   :  { %v275_v48 = vadd.f32 1.0, %v273_v44  ;;  %v276_v49 = vadd.f32 1.0, %v274_v45 }
  0xee   :  { %vm277_vm0 = vcmp.gt.f32.partialorder %v275_v48, %v271_v46  ;;  %vm278_vm1 = vcmp.gt.f32.partialorder %v276_v49, %v272_v47 }
  0xef   :  { %v404_v50 = vsel %vm277_vm0, 1.0, %v410_v35  ;;  %v405_v51 = vsel %vm278_vm1, 1.0, %v410_v35 }
  0xf0   :  { %v283_v52 = vadd.f32 %v405_v51, %v404_v50  ;;  %v290_v53 = vmul.f32 %v404_v50, %v469_v25  ;;  %v291_v54 = vmul.f32 %v405_v51, %v471_v26 }
  0xf2   :  { %v284_v55 = vrot.slane %v283_v52, 4  ;;  %v292_v56 = vadd.f32 %v291_v54, %v290_v53 }
  0xf4   :  { %v285_v57 = vadd.f32 %v284_v55, %v283_v52  ;;  %v293_v58 = vrot.slane %v292_v56, 4 }
  0xf6   :  { %v286_v59 = vrot.slane %v285_v57, 2  ;;  %v294_v61 = vadd.f32 %v293_v58, %v292_v56 }
  0xf8   :  { %v287_v60 = vadd.f32 %v286_v59, %v285_v57  ;;  %v295_v0 = vrot.slane %v294_v61, 2 }
  0xfa   :  { %v288_v62 = vrot.slane %v287_v60, 1  ;;  %v296_v1 = vadd.f32 %v295_v0, %v294_v61 }
  0xfc   :  { %v289_v63 = vadd.f32 %v288_v62, %v287_v60  ;;  %v297_v3 = vrot.slane %v296_v1, 1 }
  0xfe   :  { %408 = vrcp.f32 %v289_v63  ;;  %v311_v5 = vand.u32 2147483648, %v289_v63  ;;  %v298_v6 = vadd.f32 %v297_v3, %v296_v1  ;;  %v309_v8 = vand.u32 2147483647, %v289_v63 }
  0xff   :  { %vm305_vm3 = vweird.f32 %v289_v63 }
 0x100   :  { %v312_v10 = vor.u32 1.1754944e-38, %v311_v5  ;;  %v406_v11 = vadd.f32 -1.0, %v298_v6  ;;  %vm310_vm5 = vcmp.eq.f32.partialorder %v309_v8, 8.507059e+37 }
 0x104   :  { %v409_v2 = vpop.eup %408 }
 0x105   :  { %v301_v35 = vmul.f32 %v409_v2, %v289_v63  ;;  %vm306_vm2 = vweird.f32 %v409_v2 }
 0x106   :  { %vm307_vm4 = vmor %vm305_vm3, %vm306_vm2 }
 0x107   :  { %v302_v4 = vsub.f32 1.0, %v301_v35 }
 0x109   :  { %v303_v7 = vmul.f32 %v409_v2, %v302_v4 }
 0x10b   :  { %v304_v9 = vadd.f32 %v409_v2, %v303_v7 }
 0x10d   :  { %v308_v12 = vsel %vm307_vm4, %v409_v2, %v304_v9 }
 0x10e   :  { %v313_v13 = vsel %vm310_vm5, %v312_v10, %v308_v12 }
 0x10f   :  { %v314_v14 = vmul.f32 %v406_v11, %v313_v13 }
 0x111   :  { %v315_v15 = vsub.f32 %v469_v25, %v314_v14  ;;  %v316_v17 = vsub.f32 %v471_v26, %v314_v14 }
 0x113   :  { %v317_v16 = vmax.f32 %v315_v15, 0.0  ;;  %v318_v18 = vmax.f32 %v316_v17, 0.0 }
 0x115   :  { %319 = vxpose.xlu1.b32.start [1/2] (short) %v317_v16, 128 }
 0x11d   :  { %320 = vxpose.xlu1.b32.end [2/2] (short) %v318_v18, 128 }
 0x1b9   :  { %v335_v19 = vpop.trf.xlu1 }
 0x1ba   :  { %352 = vst.msk [vmem:[%s638_s1] sm:$0xff] %vm351_vm6, %v335_v19 }
 0x1c1   :  { %v336_v20 = vpop.trf.xlu1 }
 0x1c2   :  { %353 = vst.msk [vmem:[%s638_s1 + $0x8] sm:$0xff] %vm351_vm6, %v336_v20 }
 0x1c9   :  { %v337_v25 = vpop.trf.xlu1 }
 0x1ca   :  { %354 = vst.msk [vmem:[%s638_s1 + $0x10] sm:$0xff] %vm351_vm6, %v337_v25 }
 0x1d1   :  { %v338_v26 = vpop.trf.xlu1 }
 0x1d2   :  { %355 = vst.msk [vmem:[%s638_s1 + $0x18] sm:$0xff] %vm351_vm6, %v338_v26 }
 0x1d9   :  { %v339_v21 = vpop.trf.xlu1 }
 0x1da   :  { %356 = vst.msk [vmem:[%s638_s1 + $0x20] sm:$0xff] %vm351_vm6, %v339_v21 }
 0x1e1   :  { %v340_v22 = vpop.trf.xlu1 }
 0x1e2   :  { %357 = vst.msk [vmem:[%s638_s1 + $0x28] sm:$0xff] %vm351_vm6, %v340_v22 }
 0x1e9   :  { %v341_v23 = vpop.trf.xlu1 }
 0x1ea   :  { %358 = vst.msk [vmem:[%s638_s1 + $0x30] sm:$0xff] %vm351_vm6, %v341_v23 }
 0x1f1   :  { %v342_v24 = vpop.trf.xlu1 }
 0x1f2   :  { %359 = vst.msk [vmem:[%s638_s1 + $0x38] sm:$0xff] %vm351_vm6, %v342_v24 }
 0x1f9   :  { %v343_v27 = vpop.trf.xlu1 }
 0x1fa   :  { %360 = vst.msk [vmem:[%s638_s1 + $0x40] sm:$0xff] %vm351_vm6, %v343_v27 }
 0x201   :  { %v344_v28 = vpop.trf.xlu1 }
 0x202   :  { %361 = vst.msk [vmem:[%s638_s1 + $0x48] sm:$0xff] %vm351_vm6, %v344_v28 }
 0x209   :  { %v345_v29 = vpop.trf.xlu1 }
 0x20a   :  { %362 = vst.msk [vmem:[%s638_s1 + $0x50] sm:$0xff] %vm351_vm6, %v345_v29 }
 0x211   :  { %v346_v30 = vpop.trf.xlu1 }
 0x212   :  { %363 = vst.msk [vmem:[%s638_s1 + $0x58] sm:$0xff] %vm351_vm6, %v346_v30 }
 0x219   :  { %v347_v31 = vpop.trf.xlu1 }
 0x21a   :  { %364 = vst.msk [vmem:[%s638_s1 + $0x60] sm:$0xff] %vm351_vm6, %v347_v31 }
 0x221   :  { %v348_v32 = vpop.trf.xlu1 }
 0x222   :  { %365 = vst.msk [vmem:[%s638_s1 + $0x68] sm:$0xff] %vm351_vm6, %v348_v32 }
 0x229   :  { %v349_v36 = vpop.trf.xlu1 }
 0x22a   :  { %366 = vst.msk [vmem:[%s638_s1 + $0x70] sm:$0xff] %vm351_vm6, %v349_v36 }
 0x231   :  { %v350_v37 = vpop.trf.xlu1 }
 0x232   :  { %367 = vst.msk [vmem:[%s638_s1 + $0x78] sm:$0xff] %vm351_vm6, %v350_v37 }

</bundles_post_ra>
